<compile_context>
chip_gen: v7x
topology: tpu7x:2x2x1
jax: 0.10.0
libtpu: 0.0.40
codegen_flags: <defaults>
</compile_context>

<pallas_src>
import jax
import jax.numpy as jnp
from jax.experimental import pallas as pl
from jax.experimental.pallas import tpu as pltpu


def gsampler_kernel(x_ref, eps_ref, w1x_ref, w1e_ref, b1_ref, w2_ref, b2_ref,
                    o_ref):
    tb, tm, DO = o_ref.shape
    D = x_ref.shape[2]
    H = w1x_ref.shape[1]
    rows = tb * tm

    # x-half of layer 1: computed once per batch row (NOT per sample), then
    # broadcast over the m samples of this tile.
    x_tile = x_ref[...].reshape(tb, D)
    hx = jnp.dot(x_tile, w1x_ref[...],
                 preferred_element_type=jnp.float32) + b1_ref[...]

    # eps-half of layer 1 (noise_scale already folded into w1e by the wrapper).
    eps = eps_ref[...].reshape(rows, D)
    he = jnp.dot(eps, w1e_ref[...], preferred_element_type=jnp.float32)

    # Fused 'concat' merge + ReLU.
    h = jnp.maximum(he.reshape(tb, tm, H) + hx.reshape(tb, 1, H), 0.0)

    # Layer 2.
    out = jnp.dot(h.reshape(rows, H), w2_ref[...],
                  preferred_element_type=jnp.float32) + b2_ref[...]
    o_ref[...] = out.reshape(tb, tm, DO).astype(o_ref.dtype)


def _largest_divisor(n, cap, multiple_of=1):
    cap = max(1, min(n, cap))
    for d in range(cap, 0, -1):
        if n % d == 0 and d % multiple_of == 0:
            return d
    return None


def gsampler_forward(x, params, *, m, noise_scale=1.0, key=None, eps=None,
                     tile_b=None, tile_m=None, vmem_limit_bytes=None):
    """gSampler forward.  x: (B, D) float32.  Returns (B, m, DO)."""
    w1x, w1e, b1, w2, b2 = params
    B, D = x.shape
    H = w1x.shape[1]
    DO = w2.shape[1]
    M = int(m)

    # Fold noise_scale into the eps-half of W1 -> eps stays a unit normal and
    # no (B*M, D)-sized scaling pass is ever materialized.
    w1e_s = (w1e * jnp.float32(noise_scale)).astype(w1e.dtype)

    if eps is None:
        if key is None:
            key = jax.random.PRNGKey(0)
        eps = jax.random.normal(key, (B, M, D), dtype=x.dtype)
    assert eps.shape == (B, M, D)

    # ---- tile selection: aim for ~512 rows (= tile_b * tile_m) per grid step.
    target_rows = 512
    if tile_m is None:
        if M <= target_rows:
            tile_m = M
        else:
            tile_m = _largest_divisor(M, target_rows, multiple_of=8) or M
    if tile_b is None:
        cap = max(1, target_rows // tile_m)
        tile_b = _largest_divisor(B, cap) or 1

    assert B % tile_b == 0 and M % tile_m == 0
    # (8, 128) rule: last-two dims of each block must be divisible by (8, 128)
    # or equal the full array dims.  We never tile D / DO, so only tile_m needs
    # to be a multiple of 8 (or the full M).
    assert tile_m % 8 == 0 or tile_m == M

    grid = (B // tile_b, M // tile_m)
    x3 = x.reshape(B, 1, D)   # free metadata reshape; keeps the x block's last
                              # two dims full-extent regardless of tile_b.

    out = pl.pallas_call(
        gsampler_kernel,
        out_shape=jax.ShapeDtypeStruct((B, M, DO), x.dtype),
        grid_spec=pltpu.PrefetchScalarGridSpec(
            num_scalar_prefetch=0,
            grid=grid,
            in_specs=[
                pl.BlockSpec((tile_b, 1, D), lambda i, j: (i, 0, 0)),       # x (no repeat)
                pl.BlockSpec((tile_b, tile_m, D), lambda i, j: (i, j, 0)),  # eps
                pl.BlockSpec((D, H), lambda i, j: (0, 0)),    # W1 x-half   (resident)
                pl.BlockSpec((D, H), lambda i, j: (0, 0)),    # W1 eps-half (scaled, resident)
                pl.BlockSpec((1, H), lambda i, j: (0, 0)),    # b1
                pl.BlockSpec((H, DO), lambda i, j: (0, 0)),   # W2
                pl.BlockSpec((1, DO), lambda i, j: (0, 0)),   # b2
            ],
            out_specs=pl.BlockSpec((tile_b, tile_m, DO),
                                   lambda i, j: (i, j, 0)),
        ),
        compiler_params=pltpu.CompilerParams(
            dimension_semantics=("parallel", "parallel"),
            vmem_limit_bytes=vmem_limit_bytes,
        ),
    )(x3, eps, w1x, w1e_s, b1, w2, b2)

    return out  # already (B, M, DO); no host-side reshape/transpose needed


def init_params(key, D, H, DO):
    """Deterministic backbone parameters.  W1 has input dim 2*D (concat merge)."""
    k1, k2, k3, k4 = jax.random.split(key, 4)
    scale1 = 1.0 / jnp.sqrt(2.0 * D)
    scale2 = 1.0 / jnp.sqrt(float(H))
    w1 = jax.random.normal(k1, (2 * D, H), dtype=jnp.float32) * scale1
    b1 = jax.random.normal(k2, (1, H), dtype=jnp.float32) * 0.01
    w2 = jax.random.normal(k3, (H, DO), dtype=jnp.float32) * scale2
    b2 = jax.random.normal(k4, (1, DO), dtype=jnp.float32) * 0.01
    # split W1 into the x-half and eps-half so concat fuses into two matmuls
    return w1[:D], w1[D:], b1, w2, b2


# TODO(synk): noise_type 'uniform'/'laplace', merge_mode 'add'/'multiply' and
# output_extractor hooks of gSampler are not implemented (only the default
# normal-noise + concat path with a fixed MLP backbone).

if __name__ == "__main__":
    B, D, H, DO = 2, 16, 32, 8
    M = 8  # m_train

    root = jax.random.PRNGKey(0)
    k_x, k_params, k_eps = jax.random.split(root, 3)

    x = jax.random.normal(k_x, (B, D), dtype=jnp.float32)
    params = init_params(k_params, D, H, DO)
    w1x, w1e, b1, w2, b2 = params
    hp = jax.lax.Precision.HIGHEST

    # 1) Full stochastic path: feed explicit eps so the pure-JAX reference
    #    (repeat x -> scale eps -> concat -> MLP) uses the identical noise.
    noise_scale = 1.5
    eps = jax.random.normal(k_eps, (B, M, D), dtype=jnp.float32)
    out = jax.block_until_ready(
        gsampler_forward(x, params, m=M, noise_scale=noise_scale, eps=eps))
    assert out.shape == (B, M, DO) and out.dtype == jnp.float32

    xr = jnp.broadcast_to(x[:, None, :], (B, M, D)).reshape(B * M, D)
    er = (eps * noise_scale).reshape(B * M, D)
    merged = jnp.concatenate([xr, er], axis=1)
    w1_full = jnp.concatenate([w1x, w1e], axis=0)
    h_ref = jnp.maximum(jnp.dot(merged, w1_full, precision=hp) + b1, 0.0)
    ref = (jnp.dot(h_ref, w2, precision=hp) + b2).reshape(B, M, DO)
    assert jnp.allclose(out, ref, atol=2e-2, rtol=2e-2)

    # 2) noise_scale = 0: eps contribution vanishes, so the kernel must reduce
    #    to the deterministic backbone on x, replicated across the m axis.
    out0 = jax.block_until_ready(
        gsampler_forward(x, params, m=M, noise_scale=0.0,
                         key=jax.random.PRNGKey(7)))
    hi = jnp.maximum(jnp.dot(x, w1x, precision=hp) + b1, 0.0)
    ref0 = jnp.broadcast_to((jnp.dot(hi, w2, precision=hp) + b2)[:, None, :],
                            (B, M, DO))
    assert jnp.allclose(out0, ref0, atol=2e-2, rtol=2e-2)

    # 3) stochasticity + determinism: samples differ across m, same key -> same
    #    output, finite everywhere.
    o1 = jax.block_until_ready(
        gsampler_forward(x, params, m=M, noise_scale=1.0,
                         key=jax.random.PRNGKey(3)))
    o2 = jax.block_until_ready(
        gsampler_forward(x, params, m=M, noise_scale=1.0,
                         key=jax.random.PRNGKey(3)))
    assert bool(jnp.all(jnp.isfinite(o1)))
    assert float(jnp.std(o1, axis=1).mean()) > 1e-3
    assert jnp.allclose(o1, o2)

    print("KERNEL_OK")
</pallas_src>

<mosaic_0001>
module attributes {stable_mosaic.version = 11 : i64} {
  func.func @gsampler_kernel(%arg0: i32, %arg1: i32, %arg2: memref<2x1x16xf32, #tpu.memory_space<vmem>>, %arg3: memref<2x8x16xf32, #tpu.memory_space<vmem>>, %arg4: memref<16x32xf32, #tpu.memory_space<vmem>>, %arg5: memref<16x32xf32, #tpu.memory_space<vmem>>, %arg6: memref<1x32xf32, #tpu.memory_space<vmem>>, %arg7: memref<32x8xf32, #tpu.memory_space<vmem>>, %arg8: memref<1x8xf32, #tpu.memory_space<vmem>>, %arg9: memref<2x8x8xf32, #tpu.memory_space<vmem>>) attributes {dimension_semantics = [#tpu.dimension_semantics<parallel>, #tpu.dimension_semantics<parallel>], iteration_bounds = array<i64: 1, 1>, scalar_prefetch = 0 : i64, scratch_operands = 0 : i64, tpu.core_type = #tpu.core_type<tc>, window_params = [{transform_indices = @transform_0, window_bounds = array<i64: 2, 1, 16>}, {transform_indices = @transform_1, window_bounds = array<i64: 2, 8, 16>}, {pipeline_mode = #tpu.pipeline_mode<synchronous>, transform_indices = @transform_2, window_bounds = array<i64: 16, 32>}, {pipeline_mode = #tpu.pipeline_mode<synchronous>, transform_indices = @transform_3, window_bounds = array<i64: 16, 32>}, {pipeline_mode = #tpu.pipeline_mode<synchronous>, transform_indices = @transform_4, window_bounds = array<i64: 1, 32>}, {pipeline_mode = #tpu.pipeline_mode<synchronous>, transform_indices = @transform_5, window_bounds = array<i64: 32, 8>}, {pipeline_mode = #tpu.pipeline_mode<synchronous>, transform_indices = @transform_6, window_bounds = array<i64: 1, 8>}, {transform_indices = @transform_7, window_bounds = array<i64: 2, 8, 8>}]} {
    %c0 = arith.constant 0 : index
    %c0_0 = arith.constant 0 : index
    %c0_1 = arith.constant 0 : index
    %0 = vector.load %arg2[%c0, %c0_0, %c0_1] : memref<2x1x16xf32, #tpu.memory_space<vmem>>, vector<2x1x16xf32>
    %1 = vector.shape_cast %0 : vector<2x1x16xf32> to vector<2x16xf32>
    %c0_2 = arith.constant 0 : index
    %c0_3 = arith.constant 0 : index
    %2 = vector.load %arg4[%c0_2, %c0_3] : memref<16x32xf32, #tpu.memory_space<vmem>>, vector<16x32xf32>
    %cst = arith.constant dense<0.000000e+00> : vector<2x32xf32>
    %3 = tpu.matmul %1, %2, %cst {dimension_numbers = #tpu.dot_dimension_numbers<[1], [0], [0], [1], [0, 0, 1, 1], [], []>} : vector<2x16xf32>, vector<16x32xf32>, vector<2x32xf32> -> vector<2x32xf32>
    %c0_4 = arith.constant 0 : index
    %c0_5 = arith.constant 0 : index
    %4 = vector.load %arg6[%c0_4, %c0_5] : memref<1x32xf32, #tpu.memory_space<vmem>>, vector<1x32xf32>
    %5 = vector.broadcast %4 : vector<1x32xf32> to vector<2x32xf32>
    %6 = arith.addf %3, %5 : vector<2x32xf32>
    %c0_6 = arith.constant 0 : index
    %c0_7 = arith.constant 0 : index
    %c0_8 = arith.constant 0 : index
    %7 = vector.load %arg3[%c0_6, %c0_7, %c0_8] : memref<2x8x16xf32, #tpu.memory_space<vmem>>, vector<2x8x16xf32>
    %8 = vector.shape_cast %7 : vector<2x8x16xf32> to vector<16x16xf32>
    %c0_9 = arith.constant 0 : index
    %c0_10 = arith.constant 0 : index
    %9 = vector.load %arg5[%c0_9, %c0_10] : memref<16x32xf32, #tpu.memory_space<vmem>>, vector<16x32xf32>
    %cst_11 = arith.constant dense<0.000000e+00> : vector<16x32xf32>
    %10 = tpu.matmul %8, %9, %cst_11 {dimension_numbers = #tpu.dot_dimension_numbers<[1], [0], [0], [1], [0, 0, 1, 1], [], []>} : vector<16x16xf32>, vector<16x32xf32>, vector<16x32xf32> -> vector<16x32xf32>
    %11 = vector.shape_cast %10 : vector<16x32xf32> to vector<2x8x32xf32>
    %12 = vector.shape_cast %6 : vector<2x32xf32> to vector<2x1x32xf32>
    %13 = vector.broadcast %12 : vector<2x1x32xf32> to vector<2x8x32xf32>
    %14 = arith.addf %11, %13 : vector<2x8x32xf32>
    %cst_12 = arith.constant 0.000000e+00 : f32
    %15 = vector.broadcast %cst_12 : f32 to vector<2x8x32xf32>
    %16 = arith.maximumf %14, %15 : vector<2x8x32xf32>
    %17 = vector.shape_cast %16 : vector<2x8x32xf32> to vector<16x32xf32>
    %c0_13 = arith.constant 0 : index
    %c0_14 = arith.constant 0 : index
    %18 = vector.load %arg7[%c0_13, %c0_14] : memref<32x8xf32, #tpu.memory_space<vmem>>, vector<32x8xf32>
    %cst_15 = arith.constant dense<0.000000e+00> : vector<16x8xf32>
    %19 = tpu.matmul %17, %18, %cst_15 {dimension_numbers = #tpu.dot_dimension_numbers<[1], [0], [0], [1], [0, 0, 1, 1], [], []>} : vector<16x32xf32>, vector<32x8xf32>, vector<16x8xf32> -> vector<16x8xf32>
    %c0_16 = arith.constant 0 : index
    %c0_17 = arith.constant 0 : index
    %20 = vector.load %arg8[%c0_16, %c0_17] : memref<1x8xf32, #tpu.memory_space<vmem>>, vector<1x8xf32>
    %21 = vector.broadcast %20 : vector<1x8xf32> to vector<16x8xf32>
    %22 = arith.addf %19, %21 : vector<16x8xf32>
    %23 = vector.shape_cast %22 : vector<16x8xf32> to vector<2x8x8xf32>
    %c0_18 = arith.constant 0 : index
    %c0_19 = arith.constant 0 : index
    %c0_20 = arith.constant 0 : index
    %24 = vector.load %arg9[%c0_18, %c0_19, %c0_20] : memref<2x8x8xf32, #tpu.memory_space<vmem>>, vector<2x8x8xf32>
    tpu.vector_store %arg9[%c0_18, %c0_19, %c0_20], %23 {strides = array<i32>} : memref<2x8x8xf32, #tpu.memory_space<vmem>>, vector<2x8x8xf32>,
    return
  }
  func.func @transform_0(%arg0: i32, %arg1: i32) -> (i32, i32, i32) {
    %c0_i32 = arith.constant 0 : i32
    %c0_i32_0 = arith.constant 0 : i32
    %c0_i32_1 = arith.constant 0 : i32
    return %arg0, %c0_i32, %c0_i32_0 : i32, i32, i32
  }
  func.func @transform_1(%arg0: i32, %arg1: i32) -> (i32, i32, i32) {
    %c0_i32 = arith.constant 0 : i32
    %c0_i32_0 = arith.constant 0 : i32
    return %arg0, %arg1, %c0_i32 : i32, i32, i32
  }
  func.func @transform_2(%arg0: i32, %arg1: i32) -> (i32, i32) {
    %c0_i32 = arith.constant 0 : i32
    %c0_i32_0 = arith.constant 0 : i32
    %c0_i32_1 = arith.constant 0 : i32
    return %c0_i32, %c0_i32_0 : i32, i32
  }
  func.func @transform_3(%arg0: i32, %arg1: i32) -> (i32, i32) {
    %c0_i32 = arith.constant 0 : i32
    %c0_i32_0 = arith.constant 0 : i32
    %c0_i32_1 = arith.constant 0 : i32
    return %c0_i32, %c0_i32_0 : i32, i32
  }
  func.func @transform_4(%arg0: i32, %arg1: i32) -> (i32, i32) {
    %c0_i32 = arith.constant 0 : i32
    %c0_i32_0 = arith.constant 0 : i32
    %c0_i32_1 = arith.constant 0 : i32
    return %c0_i32, %c0_i32_0 : i32, i32
  }
  func.func @transform_5(%arg0: i32, %arg1: i32) -> (i32, i32) {
    %c0_i32 = arith.constant 0 : i32
    %c0_i32_0 = arith.constant 0 : i32
    %c0_i32_1 = arith.constant 0 : i32
    return %c0_i32, %c0_i32_0 : i32, i32
  }
  func.func @transform_6(%arg0: i32, %arg1: i32) -> (i32, i32) {
    %c0_i32 = arith.constant 0 : i32
    %c0_i32_0 = arith.constant 0 : i32
    %c0_i32_1 = arith.constant 0 : i32
    return %c0_i32, %c0_i32_0 : i32, i32
  }
  func.func @transform_7(%arg0: i32, %arg1: i32) -> (i32, i32, i32) {
    %c0_i32 = arith.constant 0 : i32
    %c0_i32_0 = arith.constant 0 : i32
    return %arg0, %arg1, %c0_i32 : i32, i32, i32
  }
}

</mosaic_0001>

<bundles_post_ra>
// kernel: tpu_custom_call.1
= control target key start
LH: loop header
LB: loop body
LE: loop exit
PB: predicated region body
PF: predicated region fallthrough
CT: control target
= control target key end

     0   :  { %12 = vsyncpa [#allocation3], 0  ;;  %s602_s0 = inlined_call_operand.vmem [shape: f32[2,1,16], index: 0, kind: input, shape index: {}]   ;;  %s603_s1 = inlined_call_operand.vmem [shape: f32[2,8,16], index: 1, kind: input, shape index: {}]   ;;  %s604_s2 = inlined_call_operand.vmem [shape: f32[16,32], index: 2, kind: input, shape index: {}]   ;;  %s605_s3 = inlined_call_operand.vmem [shape: f32[16,32], index: 3, kind: input, shape index: {}]   ;;  %s606_s4 = inlined_call_operand.hbm [shape: f32[1,32], index: 4, kind: input, shape index: {}]   ;;  %s607_s5 = inlined_call_operand.vmem [shape: f32[32,8], index: 5, kind: input, shape index: {}]   ;;  %s608_s6 = inlined_call_operand.vmem [shape: f32[1,8], index: 6, kind: input, shape index: {}]   ;;  %s609_s7 = inlined_call_operand.hbm [shape: f32[2,8,8], index: 7, kind: output, shape index: {}]  }
   0x1   :  { %13 = vsyncpa [#allocation4], 0  ;;  %s491_s24 = smov [#allocation2]   ;;  %s443_s28 = scalar_lea.hbm %s606_s4, 16 }
   0x2   :  { %s28_s25 = sshll.u32 %s491_s24, 4  ;;  %p444_p0 = scmp.ne.s32.totalorder %s606_s4, %s443_s28  ;;  %s29_s25 = int_to_ptr.vmem [resolvable:$true] %s28_s25 }
   0x3   :  { %p447_p1 = scmp.lt.u32.totalorder %s443_s28, %s606_s4 }
   0x5   :  { %p449_p2 = pnand %p447_p1, %p444_p0 }
   0x7   :  { %452 = shalt.err (!%p449_p2)
}
   0x8   :  { %s453_s10 = scalar_lea.vmem %s29_s25, 16  ;;  %s457_s11 = scalar_lea.vmem %s29_s25, 32 }
   0x9   :  { %p454_p3 = scmp.ne.s32.totalorder %s29_s25, %s453_s10  ;;  %p458_p4 = scmp.lt.s32.totalorder %s29_s25, %s29_s25 }
   0xa   :  { %p459_p5 = scmp.lt.s32.totalorder %s457_s11, %s453_s10 }
   0xc   :  { %p460_p6 = por %p459_p5, %p458_p4 }
   0xe   :  { %p461_p7 = pnand %p460_p6, %p454_p3 }
  0x10   :  { %464 = shalt.err (!%p461_p7)
}
  0x11   :  { %31 = dma.hbm_to_vmem [thread:$0]  %s606_s4, 16, %s29_s25, [#allocation3]  }
  0x12   :  { %487 = dma.done.wait [#allocation3], 16  }
  0x13   :  { %488 = vsyncadd [#allocation3], 4294967280  ;;  %v56_v0 = vlaneseq  ;;  %v492_v1 = vmov 0.0|0.0   ;;  %vm493_vm0 = vmmov 0   ;;  %v494_v2 = vmov 0.0   ;;  %v41_v7 = vld [vmem:[%s604_s2] sm:$0xff] }
  0x14   :  { %420 = vmatprep.subr.bf16.mxu1 %v492_v1  ;;  %399 = vmatprep.mubr.msk.f32.mxu1 %vm493_vm0, %v494_v2  ;;  %v495_v3 = vmov 1966171168   ;;  %v42_v8 = vld [vmem:[%s604_s2 + $0x8] sm:$0xff]  ;;  %v39_v9 = vld [vmem:[%s602_s0] sm:$0x1]  ;;  %vm67_vm1 = vcmask 130048  }
  0x15   :  { %v54_v4 = vunpack.c.l.s4 %v495_v3  ;;  %v57_v5 = vshrl.u32 %v56_v0, 7  ;;  %v421_v11 = vpack.c.bf16 %v42_v8, %v41_v7  ;;  %v40_v12 = vld [vmem:[%s602_s0 + $0x1] sm:$0x1]  ;;  %v143_v14 = vld [vmem:[%s605_s3 + $0x8] sm:$0xff]  ;;  %v264_v24 = vld [vmem:[%s607_s5 + $0x10] sm:$0xff]  ;;  %vm273_vm2 = vcmask 261120  }
  0x16   :  { %v142_v13 = vld [vmem:[%s605_s3] sm:$0xff]  ;;  %v52_v15 = vcombine.low %v39_v9, %v40_v12  ;;  %v141_v20 = vld [vmem:[%s603_s1 + $0x8] sm:$0xff]  ;;  %v265_v25 = vld [vmem:[%s607_s5 + $0x18] sm:$0xff]  ;;  %s496_s11 = smov [#allocation5]   ;;  %vm355_vm3 = vcmask 64512  }
  0x17   :  { %v55_v6 = vunpack.c.0.s8 %v54_v4  ;;  %v423_v16 = vpack.c.bf16 %v143_v14, %v142_v13  ;;  %422 = vmatpush3.bf16.msra.mxu1 %v421_v11  ;;  %v140_v19 = vld [vmem:[%s603_s1] sm:$0xff]  ;;  %v263_v22 = vld [vmem:[%s607_s5 + $0x8] sm:$0xff]  ;;  %v431_v26 = vpack.c.bf16 %v265_v25, %v264_v24  ;;  %v250_v32 = vsub.s32 0, %v57_v5  ;;  %s363_s12 = sshll.u32 %s496_s11, 4  ;;  %s364_s12 = int_to_ptr.vmem [resolvable:$true] %s363_s12 }
  0x18   :  { %v262_v21 = vld [vmem:[%s607_s5] sm:$0xff]  ;;  %s465_s13 = scalar_lea.vmem %s364_s12, 256  ;;  %p470_p9 = scmp.lt.s32.totalorder %s364_s12, %s364_s12 }
  0x19   :  { %v58_v10 = vsub.s32 %v55_v6, %v57_v5  ;;  %424 = vmatprep.subr.bf16.mxu1 %v423_v16  ;;  %v427_v23 = vpack.c.bf16 %v263_v22, %v262_v21  ;;  %v375_v27 = vld [vmem:[#allocation2] ss:$0 sm:$0xff]  ;;  %p466_p8 = scmp.ne.s32.totalorder %s364_s12, %s465_s13  ;;  %p471_p10 = scmp.lt.s32.totalorder %s465_s13, %s465_s13 }
  0x1a   :  { %v379_v44 = vld [vmem:[%s608_s6] ss:$0 sm:$0xff] }
  0x1b   :  { %v59_v17 = vrot.slane %v52_v15, %v58_v10  ;;  %428 = vmatprep.subr.bf16.mxu0 %v427_v23  ;;  %p472_p11 = por %p471_p10, %p470_p9 }
  0x1c   :  { %430 = vmatpush3.bf16.msra.mxu0 %v427_v23 }
  0x1d   :  { %v66_v18 = vrot.slane %v59_v17, %v58_v10  ;;  %432 = vmatprep.subr.bf16.mxu0 %v431_v26  ;;  %p473_p12 = pnand %p472_p11, %p466_p8 }
  0x1f   :  { %400 = vmatmul.mubr.msk.f32.vlgmr.msra.gmra.mrb[0].mxu1 %vm67_vm1, %v66_v18 }
  0x20   :  { %426 = vmatpush3.bf16.msra.mxu1 %v423_v16  ;;  %406 = vmatprep.mubr.msk.f32.mxu1 %vm67_vm1, %v140_v19 }
  0x21   :  { %434 = vmatpush3.bf16.msra.mxu0 %v431_v26 }
  0x23   :  { %407 = vmatmul.mubr.msk.f32.vlgmr.msra.gmra.mrb[2].mxu1 %vm67_vm1, %v141_v20 }
  0xf2   :  { %v136_v28 = vpop.f32.mrb[0].mxu1 }
  0xf3   :  { %v137_v29 = vadd.f32 %v375_v27, %v136_v28  ;;  %v401_v30 = vpop.f32.mrb[1].mxu1 }
  0xf5   :  { %v232_v31 = vrot.slane %v137_v29, %v58_v10 }
  0xf6   :  { %v408_v33 = vpop.f32.mrb[2].mxu1 }
  0xf7   :  { %v233_v34 = vcombine.high %v232_v31, %v232_v31  ;;  %v216_v35 = vpop.f32.mrb[3].mxu1  ;;  %v240_v36 = vrot.slane %v232_v31, %v58_v10 }
  0xf9   :  { %v247_v37 = vrot.slane %v233_v34, %v58_v10  ;;  %v251_v38 = vrot.slane %v240_v36, %v250_v32 }
  0xfb   :  { %v255_v39 = vrot.slane %v247_v37, %v250_v32  ;;  %v258_v40 = vadd.f32 %v251_v38, %v216_v35 }
  0xfd   :  { %v259_v41 = vadd.f32 %v408_v33, %v255_v39  ;;  %v260_v42 = vmax.f32 %v258_v40, 0.0 }
  0xff   :  { %v261_v43 = vmax.f32 %v259_v41, 0.0  ;;  %417 = vmatprep.mubr.msk.f32.mxu0 %vm273_vm2, %v260_v42 }
 0x101   :  { %418 = vmatmul.mubr.msk.f32.vlgmr.msra.gmra.mrb[0].mxu0 %vm273_vm2, %v261_v43 }
 0x1d4   :  { %v419_v45 = vpop.f32.mrb[0].mxu0 }
 0x1d5   :  { %v352_v46 = vadd.f32 %v419_v45, %v379_v44  ;;  %v346_v47 = vpop.f32.mrb[1].mxu0 }
 0x1d6   :  { %v347_v48 = vadd.f32 %v379_v44, %v346_v47 }
 0x1d7   :  { %357 = vst.msk [vmem:[#allocation5 + $0x8] sm:$0xff] %vm355_vm3, %v352_v46 }
 0x1d8   :  { %356 = vst.msk [vmem:[#allocation5] sm:$0xff] %vm355_vm3, %v347_v48 }
 0x1d9   :  { %476 = shalt.err (!%p473_p12)
}
 0x1da   :  { %s477_s6 = scalar_lea.hbm %s609_s7, 256 }
 0x1db   :  { %p478_p13 = scmp.ne.s32.totalorder %s609_s7, %s477_s6  ;;  %p481_p0 = scmp.lt.u32.totalorder %s477_s6, %s609_s7 }
 0x1dd   :  { %p483_p1 = pnand %p481_p0, %p478_p13 }
 0x1df   :  { %486 = shalt.err (!%p483_p1)
}
 0x1e0   :  { %s497_s19 = smov 128   ;;  %s498_s20 = smov 8  }
 0x1e1   :  { %369 = dma.vmem_to_hbm [thread:$0]  %s364_s12, 256, %s609_s7, [#allocation4], %s497_s19, %s497_s19, %s498_s20  }
 0x1e2   :  { %489 = dma.done.wait [#allocation4], 256  }
 0x1e3   :  { %490 = vsyncadd [#allocation4], 4294967040 }
 0x1e4   :  { %373 = vsyncpa [#allocation3], 1 }
 0x1e5   :  { %374 = vsyncpa [#allocation4], 1 }

</bundles_post_ra>
